<compile_context>
chip_gen: v7x
topology: tpu7x:2x2x1
jax: 0.10.0
libtpu: 0.0.40
codegen_flags: <defaults>
</compile_context>

<pallas_src>
import jax
import jax.numpy as jnp
from jax import lax
from jax.experimental import pallas as pl
from jax.experimental.pallas import tpu as pltpu


def _round_up(x, m):
    return ((x + m - 1) // m) * m


def _gemm_kernel_acc(x_ref, w_ref, o_ref, acc_ref):
    """o = x @ w.T accumulated over the K grid axis in a f32 VMEM scratch."""
    @pl.when(pl.program_id(2) == 0)
    def _():
        acc_ref[...] = jnp.zeros_like(acc_ref)

    acc_ref[...] += lax.dot_general(
        x_ref[...], w_ref[...],
        dimension_numbers=(((1,), (1,)), ((), ())),   # contract K of x with K of w
        preferred_element_type=jnp.float32,
    )

    @pl.when(pl.program_id(2) == pl.num_programs(2) - 1)
    def _():
        o_ref[...] = acc_ref[...].astype(o_ref.dtype)


def _gemm_kernel_single_k(x_ref, w_ref, o_ref):
    """Single K block: write the MXU result straight to the output tile."""
    o_ref[...] = lax.dot_general(
        x_ref[...], w_ref[...],
        dimension_numbers=(((1,), (1,)), ((), ())),
        preferred_element_type=jnp.float32,
    ).astype(o_ref.dtype)


def gemm_big_matmul(x2d, w_big, *, tm=None, tn=None, tk=None):
    """out[M, N] = x2d[M, K] @ w_big[N, K].T with f32 accumulation."""
    M, K = x2d.shape
    N, K2 = w_big.shape
    assert K == K2, f"K mismatch: {K} vs {K2}"

    # Tile defaults: sublane-aligned M tile, lane-dense (>=128) N tile,
    # large K tile.  Capped so 2*(tm*tk + tn*tk)*2B + tm*tn*(4+2*2)B stays
    # well under the scoped-VMEM defaults of every TPU generation.
    tm = tm if tm is not None else min(_round_up(M, 8), 256)
    tn = tn if tn is not None else min(_round_up(N, 128), 512)
    tk = tk if tk is not None else min(_round_up(K, 128), 2048)

    # Pad every dim up to a tile multiple -> no partial edge blocks.
    Mp, Np, Kp = _round_up(M, tm), _round_up(N, tn), _round_up(K, tk)
    if (Mp, Kp) != (M, K):
        x2d = jnp.pad(x2d, ((0, Mp - M), (0, Kp - K)))
    if (Np, Kp) != (N, K):
        w_big = jnp.pad(w_big, ((0, Np - N), (0, Kp - K)))

    grid = (Mp // tm, Np // tn, Kp // tk)
    single_k = grid[2] == 1

    itemsize = jnp.dtype(x2d.dtype).itemsize
    cost = pl.CostEstimate(
        flops=2 * Mp * Np * Kp,
        bytes_accessed=(Mp * Kp + Np * Kp + Mp * Np) * itemsize,
        transcendentals=0,
    )

    out = pl.pallas_call(
        _gemm_kernel_single_k if single_k else _gemm_kernel_acc,
        out_shape=jax.ShapeDtypeStruct((Mp, Np), x2d.dtype),
        grid_spec=pltpu.PrefetchScalarGridSpec(
            num_scalar_prefetch=0,
            grid=grid,
            in_specs=[
                pl.BlockSpec((tm, tk), lambda i, j, k: (i, k)),   # x  (M, K)
                pl.BlockSpec((tn, tk), lambda i, j, k: (j, k)),   # w  (N, K)
            ],
            out_specs=pl.BlockSpec((tm, tn), lambda i, j, k: (i, j)),
            scratch_shapes=(
                [] if single_k else [pltpu.VMEM((tm, tn), jnp.float32)]
            ),
        ),
        compiler_params=pltpu.CompilerParams(
            dimension_semantics=("parallel", "parallel", "arbitrary"),
        ),
        cost_estimate=cost,
    )(x2d, w_big)

    if (Mp, Np) != (M, N):
        out = out[:M, :N]
    return out


def gemm_big_forward(x, w_big, *, tm=None, tn=None, tk=None):
    """Equivalent of GemmBig.forward: x @ w_big.T (no bias).

    x:      (..., in_features)
    w_big:  (2*out_features, in_features)  -- torch nn.Linear weight layout
    """
    *lead, K = x.shape
    M = 1
    for d in lead:
        M *= d
    x2d = x.reshape(M, K)
    out2d = gemm_big_matmul(x2d, w_big, tm=tm, tn=tn, tk=tk)
    return out2d.reshape(*lead, w_big.shape[0])


if __name__ == "__main__":
    # Shapes: batch=2, seq=8, in_features=32, out_features=32 -> fused N=64
    batch, seq = 2, 8
    in_features, out_features = 32, 32

    key = jax.random.PRNGKey(0)
    kx, k1, k2 = jax.random.split(key, 3)

    # Deterministic "GemmCat" weights (torch Linear layout: (out, in)), fused
    # by concat along dim 0 exactly as GemmBig.__init__ does.
    w1 = jax.random.normal(k1, (out_features, in_features), jnp.float32) * 0.05
    w2 = jax.random.normal(k2, (out_features, in_features), jnp.float32) * 0.05
    w_big = jnp.concatenate([w1, w2], axis=0).astype(jnp.bfloat16)  # (64, 32)

    x = (jax.random.normal(kx, (batch, seq, in_features), jnp.float32) * 0.5
         ).astype(jnp.bfloat16)

    out = gemm_big_forward(x, w_big)
    out = jax.block_until_ready(out)

    # Reference check in plain JAX (f32) to validate kernel semantics.
    ref = jnp.einsum(
        "bsk,nk->bsn", x.astype(jnp.float32), w_big.astype(jnp.float32)
    )
    assert out.shape == (batch, seq, 2 * out_features)
    assert out.dtype == jnp.bfloat16
    err = jnp.max(jnp.abs(out.astype(jnp.float32) - ref))
    assert float(err) < 5e-2, f"max abs err {float(err)}"

    print("KERNEL_OK")
</pallas_src>

<mosaic_0001>
module attributes {stable_mosaic.version = 11 : i64} {
  func.func @_gemm_kernel_single_k(%arg0: i32, %arg1: i32, %arg2: i32, %arg3: memref<16x128xbf16, #tpu.memory_space<vmem>>, %arg4: memref<128x128xbf16, #tpu.memory_space<vmem>>, %arg5: memref<16x128xbf16, #tpu.memory_space<vmem>>) attributes {dimension_semantics = [#tpu.dimension_semantics<parallel>, #tpu.dimension_semantics<parallel>, #tpu.dimension_semantics<arbitrary>], iteration_bounds = array<i64: 1, 1, 1>, scalar_prefetch = 0 : i64, scratch_operands = 0 : i64, tpu.core_type = #tpu.core_type<tc>, window_params = [{transform_indices = @transform_0, window_bounds = array<i64: 16, 128>}, {transform_indices = @transform_1, window_bounds = array<i64: 128, 128>}, {transform_indices = @transform_2, window_bounds = array<i64: 16, 128>}]} {
    %c0 = arith.constant 0 : index
    %c0_0 = arith.constant 0 : index
    %0 = vector.load %arg3[%c0, %c0_0] : memref<16x128xbf16, #tpu.memory_space<vmem>>, vector<16x128xbf16>
    %c0_1 = arith.constant 0 : index
    %c0_2 = arith.constant 0 : index
    %1 = vector.load %arg4[%c0_1, %c0_2] : memref<128x128xbf16, #tpu.memory_space<vmem>>, vector<128x128xbf16>
    %cst = arith.constant dense<0.000000e+00> : vector<16x128xf32>
    %2 = tpu.matmul %0, %1, %cst {dimension_numbers = #tpu.dot_dimension_numbers<[1], [1], [0], [0], [0, 0, 1, 0], [], []>} : vector<16x128xbf16>, vector<128x128xbf16>, vector<16x128xf32> -> vector<16x128xf32>
    %3 = arith.truncf %2 : vector<16x128xf32> to vector<16x128xbf16>
    %c0_3 = arith.constant 0 : index
    %c0_4 = arith.constant 0 : index
    %4 = vector.load %arg5[%c0_3, %c0_4] : memref<16x128xbf16, #tpu.memory_space<vmem>>, vector<16x128xbf16>
    tpu.vector_store %arg5[%c0_3, %c0_4], %3 {strides = array<i32>} : memref<16x128xbf16, #tpu.memory_space<vmem>>, vector<16x128xbf16>,
    return
  }
  func.func @transform_0(%arg0: i32, %arg1: i32, %arg2: i32) -> (i32, i32) {
    %c0_i32 = arith.constant 0 : i32
    return %arg0, %arg2 : i32, i32
  }
  func.func @transform_1(%arg0: i32, %arg1: i32, %arg2: i32) -> (i32, i32) {
    %c0_i32 = arith.constant 0 : i32
    return %arg1, %arg2 : i32, i32
  }
  func.func @transform_2(%arg0: i32, %arg1: i32, %arg2: i32) -> (i32, i32) {
    %c0_i32 = arith.constant 0 : i32
    return %arg0, %arg1 : i32, i32
  }
}

</mosaic_0001>

<bundles_post_ra>
// kernel: tpu_custom_call.1
= control target key start
LH: loop header
LB: loop body
LE: loop exit
PB: predicated region body
PF: predicated region fallthrough
CT: control target
= control target key end

     0   :  { %7 = vsyncpa [#allocation3], 0  ;;  %s384_s0 = inlined_call_operand.hbm [shape: bf16[16,128], index: 0, kind: input, shape index: {}]   ;;  %s385_s1 = inlined_call_operand.hbm [shape: bf16[128,128], index: 1, kind: input, shape index: {}]   ;;  %s386_s2 = inlined_call_operand.hbm [shape: bf16[16,128], index: 2, kind: output, shape index: {}]  }
   0x1   :  { %8 = vsyncpa [#allocation6], 0 }
   0x2   :  { %9 = vsyncpa [#allocation4], 0  ;;  %s317_s9 = smov [#allocation2]   ;;  %s245_s13 = scalar_lea.hbm %s384_s0, 128 }
   0x3   :  { %s15_s10 = sshll.u32 %s317_s9, 4  ;;  %p246_p0 = scmp.ne.s32.totalorder %s384_s0, %s245_s13  ;;  %s16_s10 = int_to_ptr.vmem [resolvable:$true] %s15_s10 }
   0x4   :  { %p249_p1 = scmp.lt.u32.totalorder %s245_s13, %s384_s0 }
   0x6   :  { %p251_p2 = pnand %p249_p1, %p246_p0 }
   0x8   :  { %254 = shalt.err (!%p251_p2)
}
   0x9   :  { %s255_s18 = scalar_lea.vmem %s16_s10, 128  ;;  %p260_p4 = scmp.lt.s32.totalorder %s16_s10, %s16_s10 }
   0xa   :  { %p256_p3 = scmp.ne.s32.totalorder %s16_s10, %s255_s18  ;;  %p261_p5 = scmp.lt.s32.totalorder %s255_s18, %s255_s18 }
   0xc   :  { %p262_p6 = por %p261_p5, %p260_p4 }
   0xe   :  { %p263_p7 = pnand %p262_p6, %p256_p3 }
  0x10   :  { %266 = shalt.err (!%p263_p7)
}
  0x11   :  { %s318_s19 = smov 64   ;;  %s319_s20 = smov 4  }
  0x12   :  { %21 = dma.hbm_to_vmem [thread:$0]  %s384_s0, 128, %s16_s10, [#allocation3], %s318_s19, %s318_s19, %s319_s20  }
  0x13   :  { %s320_s23 = smov [#allocation5]   ;;  %s267_s27 = scalar_lea.hbm %s385_s1, 1024 }
  0x14   :  { %s27_s24 = sshll.u32 %s320_s23, 4  ;;  %p268_p8 = scmp.ne.s32.totalorder %s385_s1, %s267_s27  ;;  %s28_s24 = int_to_ptr.vmem [resolvable:$true] %s27_s24 }
  0x15   :  { %p271_p9 = scmp.lt.u32.totalorder %s267_s27, %s385_s1 }
  0x17   :  { %p273_p10 = pnand %p271_p9, %p268_p8 }
  0x19   :  { %276 = shalt.err (!%p273_p10)
}
  0x1a   :  { %s277_s4 = scalar_lea.vmem %s28_s24, 1024  ;;  %p282_p12 = scmp.lt.s32.totalorder %s28_s24, %s28_s24 }
  0x1b   :  { %p278_p11 = scmp.ne.s32.totalorder %s28_s24, %s277_s4  ;;  %p283_p13 = scmp.lt.s32.totalorder %s277_s4, %s277_s4 }
  0x1d   :  { %p284_p0 = por %p283_p13, %p282_p12 }
  0x1f   :  { %p285_p1 = pnand %p284_p0, %p278_p11 }
  0x21   :  { %288 = shalt.err (!%p285_p1)
}
  0x22   :  { %33 = dma.hbm_to_vmem [thread:$0]  %s385_s1, 1024, %s28_s24, [#allocation6], %s318_s19, %s318_s19, %s319_s20  }
  0x23   :  { %311 = dma.done.wait [#allocation3], 128  }
  0x24   :  { %312 = vsyncadd [#allocation3], 4294967168 }
  0x25   :  { %313 = dma.done.wait [#allocation6], 1024  }
  0x26   :  { %314 = vsyncadd [#allocation6], 4294966272  ;;  %v321_v0 = vmov 0.0   ;;  %vm322_vm0 = vmmov 0   ;;  %v236_v1 = vld [vmem:[#allocation5] sm:$0xff]   ;;  %v237_v2 = vld [vmem:[#allocation5 + $0x8] sm:$0xff]  }
  0x27   :  { %209 = vmatprep.subr.bf16.mxu0 %v321_v0  ;;  %225 = vmatprep.mubr.msk.bf16.mxu0 %vm322_vm0, %v321_v0  ;;  %v238_v3 = vld [vmem:[#allocation5 + $0x10] sm:$0xff]   ;;  %v239_v4 = vld [vmem:[#allocation5 + $0x18] sm:$0xff]   ;;  %v240_v5 = vld [vmem:[#allocation5 + $0x20] sm:$0xff]   ;;  %s323_s1 = smov [#allocation7]  }
  0x28   :  { %210 = vmatpush3.bf16.xpose.msra.mxu0 %v236_v1  ;;  %v241_v6 = vld [vmem:[#allocation5 + $0x28] sm:$0xff]   ;;  %v242_v7 = vld [vmem:[#allocation5 + $0x30] sm:$0xff]   ;;  %v243_v8 = vld [vmem:[#allocation5 + $0x38] sm:$0xff]   ;;  %s169_s6 = sshll.u32 %s323_s1, 4  ;;  %s170_s6 = int_to_ptr.vmem [resolvable:$true] %s169_s6 }
  0x29   :  { %211 = vmatprep.subr.bf16.mxu0 %v321_v0  ;;  %v244_v9 = vld [vmem:[#allocation2] sm:$0xff]   ;;  %s289_s7 = scalar_lea.vmem %s170_s6, 128  ;;  %p294_p3 = scmp.lt.s32.totalorder %s170_s6, %s170_s6 }
  0x2a   :  { %p290_p2 = scmp.ne.s32.totalorder %s170_s6, %s289_s7  ;;  %p295_p4 = scmp.lt.s32.totalorder %s289_s7, %s289_s7 }
  0x2c   :  { %p296_p5 = por %p295_p4, %p294_p3 }
  0x2e   :  { %p297_p6 = pnand %p296_p5, %p290_p2 }
  0x30   :  { %212 = vmatpush3.bf16.xpose.msra.mxu0 %v237_v2 }
  0x31   :  { %213 = vmatprep.subr.bf16.mxu0 %v321_v0 }
  0x38   :  { %214 = vmatpush3.bf16.xpose.msra.mxu0 %v238_v3 }
  0x39   :  { %215 = vmatprep.subr.bf16.mxu0 %v321_v0 }
  0x40   :  { %216 = vmatpush3.bf16.xpose.msra.mxu0 %v239_v4 }
  0x41   :  { %217 = vmatprep.subr.bf16.mxu0 %v321_v0 }
  0x48   :  { %218 = vmatpush3.bf16.xpose.msra.mxu0 %v240_v5 }
  0x49   :  { %219 = vmatprep.subr.bf16.mxu0 %v321_v0 }
  0x50   :  { %220 = vmatpush3.bf16.xpose.msra.mxu0 %v241_v6 }
  0x51   :  { %221 = vmatprep.subr.bf16.mxu0 %v321_v0 }
  0x58   :  { %222 = vmatpush3.bf16.xpose.msra.mxu0 %v242_v7 }
  0x59   :  { %223 = vmatprep.subr.bf16.mxu0 %v321_v0 }
  0x60   :  { %224 = vmatpush3.bf16.xpose.msra.mxu0 %v243_v8 }
  0x67   :  { %226 = vmatmul.mubr.bf16.vlgmr.msra.gmra.mrb[0].mxu0 %v244_v9 }
 0x13a   :  { %v147_v10 = vpop.f32.mrb[0].mxu0 }
 0x13b   :  { %v227_v11 = vpop.f32.mrb[1].mxu0 }
 0x13c   :  { %v150_v12 = vpop.f32.mrb[2].mxu0 }
 0x13d   :  { %v198_v13 = vpack.c.bf16 %v150_v12, %v147_v10  ;;  %v228_v14 = vpop.f32.mrb[3].mxu0 }
 0x13f   :  { %199 = vst [vmem:[#allocation7] sm:$0xff] %v198_v13  }
 0x140   :  { %300 = shalt.err (!%p297_p6)
}
 0x141   :  { %s301_s10 = scalar_lea.hbm %s386_s2, 128 }
 0x142   :  { %p302_p7 = scmp.ne.s32.totalorder %s386_s2, %s301_s10  ;;  %p305_p8 = scmp.lt.u32.totalorder %s301_s10, %s386_s2 }
 0x144   :  { %p307_p9 = pnand %p305_p8, %p302_p7 }
 0x146   :  { %310 = shalt.err (!%p307_p9)
}
 0x147   :  { %175 = dma.vmem_to_hbm [thread:$0]  %s170_s6, 128, %s386_s2, [#allocation4], %s318_s19, %s318_s19, %s319_s20  }
 0x148   :  { %315 = dma.done.wait [#allocation4], 128  }
 0x149   :  { %316 = vsyncadd [#allocation4], 4294967168 }
 0x14a   :  { %179 = vsyncpa [#allocation3], 1 }
 0x14b   :  { %180 = vsyncpa [#allocation6], 1 }
 0x14c   :  { %181 = vsyncpa [#allocation4], 1 }

</bundles_post_ra>
